<compile_context>
chip_gen: v6e
topology: v6e:2x2x1
jax: 0.10.0
libtpu: 0.0.40
codegen_flags: <defaults>
</compile_context>

<pallas_src>
import functools
import math

import jax
import jax.numpy as jnp
from jax.experimental import pallas as pl
from jax.experimental.pallas import tpu as pltpu

_INV_SQRT2 = 1.0 / math.sqrt(2.0)


def _gelu(h, approximate):
    if approximate:
        # tanh approximation: the transcendental lands on the EUP slot
        # (co-issues with MXU pushes) instead of a multi-op VALU erf
        # polynomial.  Numerics differ slightly from torch.nn.GELU() exact.
        return jax.nn.gelu(h, approximate=True)
    return 0.5 * h * (1.0 + jax.lax.erf(h * jnp.float32(_INV_SQRT2)))


def _mlp_fused_kernel(x_ref, w1_ref, b1_ref, w2_ref, b2_ref, o_ref, *, approximate):
    """Fast path: full weights resident in VMEM; one row tile per grid step."""
    h = jnp.dot(x_ref[...], w1_ref[...], preferred_element_type=jnp.float32)
    h = h + b1_ref[...].astype(jnp.float32)
    h = _gelu(h, approximate)
    out = jnp.dot(h.astype(w2_ref.dtype), w2_ref[...],
                  preferred_element_type=jnp.float32)
    # b2 added exactly once; dropout is identity (p = 0.0 / eval).
    o_ref[...] = (out + b2_ref[...].astype(jnp.float32)).astype(o_ref.dtype)


def _mlp_ksplit_kernel(x_ref, w1_ref, b1_ref, w2_ref, b2_ref, o_ref, acc_ref, *,
                       approximate):
    """Fallback: hidden dim H split across the innermost grid axis."""
    k = pl.program_id(1)

    @pl.when(k == 0)
    def _():
        acc_ref[...] = jnp.zeros_like(acc_ref)

    # fc1 slice: (TM, C) @ (C, TH) + (1, TH), f32 accumulation on the MXU.
    h = jnp.dot(x_ref[...], w1_ref[...], preferred_element_type=jnp.float32)
    h = h + b1_ref[...].astype(jnp.float32)
    h = _gelu(h, approximate)

    # fc2 partial product: (TM, TH) @ (TH, C), accumulated in f32 scratch.
    acc_ref[...] += jnp.dot(h.astype(w2_ref.dtype), w2_ref[...],
                            preferred_element_type=jnp.float32)

    @pl.when(k == pl.num_programs(1) - 1)
    def _():
        o_ref[...] = (acc_ref[...] + b2_ref[...].astype(jnp.float32)).astype(o_ref.dtype)


def _pick_tile(dim, preferred, align):
    """Largest multiple of `align` that divides `dim` and is <= `preferred`;
    falls back to the full dim (always a legal block size)."""
    if dim <= preferred:
        return dim
    t = (preferred // align) * align
    while t >= align:
        if dim % t == 0:
            return t
        t -= align
    return dim


def _vmem_budget_bytes():
    """Per-generation VMEM budget with ~20% headroom for compiler scratch."""
    try:
        cap = int(pltpu.get_tpu_info().vmem_capacity_bytes)
    except Exception:
        cap = 64 * 1024 * 1024  # conservative (v7x-sized) fallback
    cap = max(min(cap, 128 * 1024 * 1024), 32 * 1024 * 1024)
    return max(int(cap * 0.8), 32 * 1024 * 1024)


def mlp_pallas(x, w1, b1, w2, b2, *, tm=None, th=None, compute_dtype=None,
               approximate_gelu=False, force_ksplit=False, vmem_budget_bytes=None):
    """x: (B, T, C); w1: (C, H); b1: (H,); w2: (H, C); b2: (C,)."""
    B, T, C = x.shape
    C_in, H = w1.shape
    assert C_in == C and w2.shape == (H, C) and b1.shape == (H,) and b2.shape == (C,)
    M = B * T
    out_dtype = x.dtype

    # Optional bf16 (etc.) fast path: cast activations/weights in the wrapper,
    # keep f32 accumulation inside the kernel.
    if compute_dtype is not None:
        x = x.astype(compute_dtype)
        w1 = w1.astype(compute_dtype)
        w2 = w2.astype(compute_dtype)

    x2d = x.reshape(M, C)
    b1_2d = b1.reshape(1, H)
    b2_2d = b2.reshape(1, C)

    x_it = jnp.dtype(x2d.dtype).itemsize
    w_it = jnp.dtype(w1.dtype).itemsize
    b_it = jnp.dtype(b1_2d.dtype).itemsize
    o_it = jnp.dtype(out_dtype).itemsize

    # dtype-aware sublane alignment for the row (second-to-last) tile dim:
    # f32 -> 8, bf16 -> 16, int8/fp8 -> 32.
    sub_align = max(8, 32 // min(x_it, o_it))

    budget = (int(vmem_budget_bytes) if vmem_budget_bytes is not None
              else _vmem_budget_bytes())

    # Row tile: large (up to 512) to amortize per-step overhead, but keep at
    # least 2 row tiles when M allows so the "parallel" axis feeds both v7x
    # TensorCores.
    if tm is None:
        tm_pref = 512
        if M >= 2 * sub_align:
            tm_pref = min(tm_pref, max(sub_align, (M // 2) // sub_align * sub_align))
        tm = _pick_tile(M, tm_pref, sub_align)
    assert M % tm == 0, (M, tm)

    weight_bytes_once = (C * H + H * C) * w_it + (H + C) * b_it

    def _fused_vmem(tm_):
        return (2 * tm_ * C * x_it            # x tile, double-buffered
                + 2 * tm_ * C * o_it          # out tile, double-buffered
                + 2 * weight_bytes_once       # weights (counted 2x, conservative)
                + tm_ * H * 4                 # live f32 fc1/GELU intermediate
                + tm_ * C * 4)                # live f32 fc2 output

    use_fused = (not force_ksplit) and (th is None) and _fused_vmem(tm) <= budget

    if use_fused:
        cost = pl.CostEstimate(
            flops=4 * M * C * H,
            transcendentals=M * H,
            bytes_accessed=M * C * x_it + M * C * o_it + weight_bytes_once,
        )
        kernel = functools.partial(_mlp_fused_kernel, approximate=approximate_gelu)
        out2d = pl.pallas_call(
            kernel,
            out_shape=jax.ShapeDtypeStruct((M, C), out_dtype),
            grid_spec=pltpu.PrefetchScalarGridSpec(
                num_scalar_prefetch=0,
                grid=(M // tm,),
                in_specs=[
                    pl.BlockSpec((tm, C), lambda i: (i, 0)),   # x rows (stream)
                    pl.BlockSpec((C, H), lambda i: (0, 0)),    # w1 resident (DMA'd once)
                    pl.BlockSpec((1, H), lambda i: (0, 0)),    # b1 resident
                    pl.BlockSpec((H, C), lambda i: (0, 0)),    # w2 resident
                    pl.BlockSpec((1, C), lambda i: (0, 0)),    # b2 resident
                ],
                out_specs=pl.BlockSpec((tm, C), lambda i: (i, 0)),
            ),
            compiler_params=pltpu.CompilerParams(
                dimension_semantics=("parallel",),
                vmem_limit_bytes=budget,
            ),
            cost_estimate=cost,
        )(x2d, w1, b1_2d, w2, b2_2d)
        return out2d.reshape(B, T, C)

    # ---- H-split fallback: weight slices streamed per H-slice + f32 acc ----
    def _ksplit_vmem(tm_, th_):
        return (2 * tm_ * C * x_it + 2 * tm_ * C * o_it
                + 2 * (C * th_ + th_ * C) * w_it + 2 * (th_ + C) * b_it
                + tm_ * th_ * 4                # live f32 fc1/GELU intermediate
                + tm_ * C * 4)                 # f32 accumulator scratch

    lane_align = 256 if H % 256 == 0 else 128  # match the 2x256^2 MXU when possible
    if th is None:
        th = H if H <= lane_align else None
        t = (min(H, 1024) // lane_align) * lane_align
        while th is None and t >= lane_align:
            if H % t == 0 and _ksplit_vmem(tm, t) <= budget:
                th = t
            t -= lane_align
        if th is None:
            th = lane_align if H % lane_align == 0 else H
    assert H % th == 0, (H, th)

    refetch = M // tm  # weight slices re-streamed once per row tile
    cost = pl.CostEstimate(
        flops=4 * M * C * H,
        transcendentals=M * H,
        bytes_accessed=M * C * x_it + M * C * o_it + refetch * weight_bytes_once,
    )
    kernel = functools.partial(_mlp_ksplit_kernel, approximate=approximate_gelu)
    out2d = pl.pallas_call(
        kernel,
        out_shape=jax.ShapeDtypeStruct((M, C), out_dtype),
        grid_spec=pltpu.PrefetchScalarGridSpec(
            num_scalar_prefetch=0,
            grid=(M // tm, H // th),
            in_specs=[
                pl.BlockSpec((tm, C), lambda i, k: (i, 0)),  # x rows
                pl.BlockSpec((C, th), lambda i, k: (0, k)),  # w1 H-slice
                pl.BlockSpec((1, th), lambda i, k: (0, k)),  # b1 H-slice
                pl.BlockSpec((th, C), lambda i, k: (k, 0)),  # w2 H-slice
                pl.BlockSpec((1, C), lambda i, k: (0, 0)),   # b2 (resident)
            ],
            out_specs=pl.BlockSpec((tm, C), lambda i, k: (i, 0)),
            scratch_shapes=[pltpu.VMEM((tm, C), jnp.float32)],
        ),
        compiler_params=pltpu.CompilerParams(
            dimension_semantics=("parallel", "arbitrary"),
            vmem_limit_bytes=budget,
        ),
        cost_estimate=cost,
    )(x2d, w1, b1_2d, w2, b2_2d)
    return out2d.reshape(B, T, C)


def mlp_reference(x, w1, b1, w2, b2):
    h = x @ w1 + b1
    h = 0.5 * h * (1.0 + jax.lax.erf(h / jnp.sqrt(2.0)))
    return h @ w2 + b2


if __name__ == "__main__":
    # Small GPT-style config: n_embd=64 (hidden=256), bias=True, dropout=0.0.
    B, T, C = 2, 16, 64
    H = 4 * C

    key = jax.random.PRNGKey(0)
    kx, kw1, kb1, kw2, kb2 = jax.random.split(key, 5)

    x = jax.random.normal(kx, (B, T, C), dtype=jnp.float32)

    # torch.nn.Linear default init: U(-1/sqrt(fan_in), 1/sqrt(fan_in)).
    # Stored as (in, out) — transposed relative to torch's (out, in).
    lim1 = 1.0 / math.sqrt(C)
    w1 = jax.random.uniform(kw1, (C, H), jnp.float32, -lim1, lim1)
    b1 = jax.random.uniform(kb1, (H,), jnp.float32, -lim1, lim1)
    lim2 = 1.0 / math.sqrt(H)
    w2 = jax.random.uniform(kw2, (H, C), jnp.float32, -lim2, lim2)
    b2 = jax.random.uniform(kb2, (C,), jnp.float32, -lim2, lim2)

    with jax.default_matmul_precision("highest"):
        ref = mlp_reference(x, w1, b1, w2, b2)

    # Tolerances are modest because XLA/MXU f32 matmuls may run as bf16 passes
    # depending on backend precision defaults; structural bugs (missing bias,
    # wrong accumulation, missing GELU) produce errors far above these.

    # 1) Default path: weights resident in VMEM (fused), f32, exact erf GELU.
    out = jax.block_until_ready(mlp_pallas(x, w1, b1, w2, b2))
    assert out.shape == (B, T, C)
    assert jnp.allclose(out, ref, atol=2e-2, rtol=2e-2), "fused path mismatch"

    # 2) Forced H-split fallback path (exercises the f32 accumulator
    #    init/finalize across the reduction axis; grid = (2, 2)).
    out_k = jax.block_until_ready(
        mlp_pallas(x, w1, b1, w2, b2, tm=16, th=128, force_ksplit=True))
    assert jnp.allclose(out_k, ref, atol=2e-2, rtol=2e-2), "k-split path mismatch"

    # 3) bf16 compute path with f32 accumulation (recommended production
    #    dtype); looser tolerance since inputs/weights are rounded to bf16.
    out_bf16 = jax.block_until_ready(
        mlp_pallas(x, w1, b1, w2, b2, compute_dtype=jnp.bfloat16))
    assert jnp.allclose(out_bf16.astype(jnp.float32), ref, atol=1e-1, rtol=1e-1), \
        "bf16 path mismatch"

    # TODO(synk): nn.Dropout with p > 0 in training mode would need
    # pltpu.prng_seed + pltpu.prng_random_bits masking; p = 0.0 / eval here.

    print("KERNEL_OK")
</pallas_src>

<mosaic_0001>
module attributes {stable_mosaic.version = 11 : i64} {
  func.func @_mlp_fused_kernel(%arg0: i32, %arg1: memref<16x64xf32, #tpu.memory_space<vmem>>, %arg2: memref<64x256xf32, #tpu.memory_space<vmem>>, %arg3: memref<1x256xf32, #tpu.memory_space<vmem>>, %arg4: memref<256x64xf32, #tpu.memory_space<vmem>>, %arg5: memref<1x64xf32, #tpu.memory_space<vmem>>, %arg6: memref<16x64xf32, #tpu.memory_space<vmem>>) attributes {dimension_semantics = [#tpu.dimension_semantics<parallel>], iteration_bounds = array<i64: 2>, scalar_prefetch = 0 : i64, scratch_operands = 0 : i64, tpu.core_type = #tpu.core_type<tc>, window_params = [{transform_indices = @transform_0, window_bounds = array<i64: 16, 64>}, {pipeline_mode = #tpu.pipeline_mode<synchronous>, transform_indices = @transform_1, window_bounds = array<i64: 64, 256>}, {pipeline_mode = #tpu.pipeline_mode<synchronous>, transform_indices = @transform_2, window_bounds = array<i64: 1, 256>}, {pipeline_mode = #tpu.pipeline_mode<synchronous>, transform_indices = @transform_3, window_bounds = array<i64: 256, 64>}, {pipeline_mode = #tpu.pipeline_mode<synchronous>, transform_indices = @transform_4, window_bounds = array<i64: 1, 64>}, {transform_indices = @transform_5, window_bounds = array<i64: 16, 64>}]} {
    %c0 = arith.constant 0 : index
    %c0_0 = arith.constant 0 : index
    %0 = vector.load %arg1[%c0, %c0_0] : memref<16x64xf32, #tpu.memory_space<vmem>>, vector<16x64xf32>
    %c0_1 = arith.constant 0 : index
    %c0_2 = arith.constant 0 : index
    %1 = vector.load %arg2[%c0_1, %c0_2] : memref<64x256xf32, #tpu.memory_space<vmem>>, vector<64x256xf32>
    %cst = arith.constant dense<0.000000e+00> : vector<16x256xf32>
    %2 = tpu.matmul %0, %1, %cst {dimension_numbers = #tpu.dot_dimension_numbers<[1], [0], [0], [1], [0, 0, 1, 1], [], []>} : vector<16x64xf32>, vector<64x256xf32>, vector<16x256xf32> -> vector<16x256xf32>
    %c0_3 = arith.constant 0 : index
    %c0_4 = arith.constant 0 : index
    %3 = vector.load %arg3[%c0_3, %c0_4] : memref<1x256xf32, #tpu.memory_space<vmem>>, vector<1x256xf32>
    %4 = vector.broadcast %3 : vector<1x256xf32> to vector<16x256xf32>
    %5 = arith.addf %2, %4 : vector<16x256xf32>
    %cst_5 = arith.constant 5.000000e-01 : f32
    %6 = vector.broadcast %cst_5 : f32 to vector<16x256xf32>
    %7 = arith.mulf %6, %5 : vector<16x256xf32>
    %cst_6 = arith.constant 0.707106769 : f32
    %8 = vector.broadcast %cst_6 : f32 to vector<16x256xf32>
    %9 = arith.mulf %5, %8 : vector<16x256xf32>
    %10 = math.erf %9 : vector<16x256xf32>
    %cst_7 = arith.constant 1.000000e+00 : f32
    %11 = vector.broadcast %cst_7 : f32 to vector<16x256xf32>
    %12 = arith.addf %11, %10 : vector<16x256xf32>
    %13 = arith.mulf %7, %12 : vector<16x256xf32>
    %c0_8 = arith.constant 0 : index
    %c0_9 = arith.constant 0 : index
    %14 = vector.load %arg4[%c0_8, %c0_9] : memref<256x64xf32, #tpu.memory_space<vmem>>, vector<256x64xf32>
    %cst_10 = arith.constant dense<0.000000e+00> : vector<16x64xf32>
    %15 = tpu.matmul %13, %14, %cst_10 {dimension_numbers = #tpu.dot_dimension_numbers<[1], [0], [0], [1], [0, 0, 1, 1], [], []>} : vector<16x256xf32>, vector<256x64xf32>, vector<16x64xf32> -> vector<16x64xf32>
    %c0_11 = arith.constant 0 : index
    %c0_12 = arith.constant 0 : index
    %16 = vector.load %arg5[%c0_11, %c0_12] : memref<1x64xf32, #tpu.memory_space<vmem>>, vector<1x64xf32>
    %17 = vector.broadcast %16 : vector<1x64xf32> to vector<16x64xf32>
    %18 = arith.addf %15, %17 : vector<16x64xf32>
    %c0_13 = arith.constant 0 : index
    %c0_14 = arith.constant 0 : index
    %19 = vector.load %arg6[%c0_13, %c0_14] : memref<16x64xf32, #tpu.memory_space<vmem>>, vector<16x64xf32>
    tpu.vector_store %arg6[%c0_13, %c0_14], %18 {strides = array<i32>} : memref<16x64xf32, #tpu.memory_space<vmem>>, vector<16x64xf32>,
    return
  }
  func.func @transform_0(%arg0: i32) -> (i32, i32) {
    %c0_i32 = arith.constant 0 : i32
    %c0_i32_0 = arith.constant 0 : i32
    return %arg0, %c0_i32 : i32, i32
  }
  func.func @transform_1(%arg0: i32) -> (i32, i32) {
    %c0_i32 = arith.constant 0 : i32
    %c0_i32_0 = arith.constant 0 : i32
    %c0_i32_1 = arith.constant 0 : i32
    return %c0_i32, %c0_i32_0 : i32, i32
  }
  func.func @transform_2(%arg0: i32) -> (i32, i32) {
    %c0_i32 = arith.constant 0 : i32
    %c0_i32_0 = arith.constant 0 : i32
    %c0_i32_1 = arith.constant 0 : i32
    return %c0_i32, %c0_i32_0 : i32, i32
  }
  func.func @transform_3(%arg0: i32) -> (i32, i32) {
    %c0_i32 = arith.constant 0 : i32
    %c0_i32_0 = arith.constant 0 : i32
    %c0_i32_1 = arith.constant 0 : i32
    return %c0_i32, %c0_i32_0 : i32, i32
  }
  func.func @transform_4(%arg0: i32) -> (i32, i32) {
    %c0_i32 = arith.constant 0 : i32
    %c0_i32_0 = arith.constant 0 : i32
    %c0_i32_1 = arith.constant 0 : i32
    return %c0_i32, %c0_i32_0 : i32, i32
  }
  func.func @transform_5(%arg0: i32) -> (i32, i32) {
    %c0_i32 = arith.constant 0 : i32
    %c0_i32_0 = arith.constant 0 : i32
    return %arg0, %c0_i32 : i32, i32
  }
}

</mosaic_0001>

<bundles_post_ra>
// kernel: tpu_custom_call.1
= control target key start
LH: loop header
LB: loop body
LE: loop exit
PB: predicated region body
PF: predicated region fallthrough
CT: control target
= control target key end

     0   :  { %10 = vsyncpa [#allocation3], 0  ;;  %s1007_s0 = inlined_call_operand.vmem [shape: f32[32,64], index: 0, kind: input, shape index: {}]   ;;  %s1008_s1 = inlined_call_operand.vmem [shape: f32[64,256], index: 1, kind: input, shape index: {}]   ;;  %s1009_s2 = inlined_call_operand.vmem [shape: f32[1,256], index: 2, kind: input, shape index: {}]   ;;  %s1010_s3 = inlined_call_operand.vmem [shape: f32[256,64], index: 3, kind: input, shape index: {}]   ;;  %s1011_s4 = inlined_call_operand.vmem [shape: f32[1,64], index: 4, kind: input, shape index: {}]   ;;  %s1012_s5 = inlined_call_operand.hbm [shape: f32[32,64], index: 5, kind: output, shape index: {}]  }
   0x1   :  { %12 = vsyncpa [#allocation3 + $0x1], 0  ;;  %s752_s18 = smov 0   ;;  %s754_s19 = smov 0  }
   0x2   :  { %s756_s20 = smov 0   ;;  %s758_s21 = smov 0  }
   0x3 LB: > { %s773_s22 = sadd.s32 4294967295, %s716_s21   ;;  %s552_s23 = sadd.s32 4294967294, %s716_s21   ;;  %s716_s21 = sphi %s758_s21, %s1018_s21   ;;  %s712_s20 = sphi %s756_s20, %s1017_s20   ;;  %s708_s19 = sphi %s754_s19, %s1016_s19   ;;  %s704_s18 = sphi %s752_s18, %s1015_s18  }
   0x4   : > { %s777_s24 = sadd.s32 1, %s716_s21   ;;  %s135_s25 = sadd.s32 1, %s712_s20 }
   0x5   : > { %s132_s26 = ssub.s32 %s716_s21, %s777_s24  ;;  %p145_p0 = scmp.ne.s32.totalorder %s712_s20, %s708_s19 }
   0x6   : > { %p133_p1 = scmp.eq.s32.totalorder %s132_s26, 0  ;;  %p146_p2 = scmp.eq.s32.totalorder %s773_s22, 1 }
   0x7   : > { %p151_p3 = scmp.ne.s32.totalorder %s708_s19, %s704_s18  ;;  %p152_p4 = scmp.eq.s32.totalorder %s552_s23, 1 }
   0x8   : > { %s788_s27 = scalar_select %p133_p1, %s712_s20, %s135_s25  }
   0x9   : > { %p790_p5 = por %p146_p2, %p145_p0  ;;  %p794_p6 = por %p152_p4, %p151_p3 }
   0xa   : > { %p555_p7 = scmp.ge.s32.totalorder %s716_s21, 1  ;;  %p191_p8 = scmp.lt.s32.totalorder %s716_s21, 3 }
   0xc   : > { %p192_p9 = pnand %p555_p7, %p191_p8 }
   0xd   : > { %s557_s11 = sshll.u32 (!%p192_p9), %s773_s22, 1  ;;  %s216_s14 = sand.u32 (!%p192_p9), 1, %s708_s19  }
   0xe   : > { %195 = sbr.rel (%p192_p9) target bundleno = 471 (0x1d7), region = 40  ;;  %p220_p10 = scmp.lt.s32.totalorder (!%p192_p9), %s557_s11, 3 }
   0xf   : > { %s556_s15 = sshll.u32 (!%p192_p9), %s216_s14, 4  ;;  %s567_s25 = sshll.u32 (!%p192_p9), %s773_s22, 8 }
  0x10   : > { %s218_s17 = scalar_lea.vmem (!%p192_p9), [#allocation2], %s556_s15  ;;  %s962_s6 = scalar_lea.hbm (!%p192_p9), %s1012_s5, %s567_s25 }
  0x11   : > { %s719_s8 = smov (!%p192_p9), [#allocation2]  }
  0x12   : > { %s660_s9 = sshll.u32 (!%p192_p9), %s719_s8, 4  ;;  %s661_s9 = int_to_ptr.vmem [resolvable:$false] %s660_s9 }
  0x13   : > { %v243_v0 = vld [vmem:[%s1008_s1 + $0x78] sm:$0xff]  ;;  %v242_v1 = vld [vmem:[%s1008_s1 + $0x70] sm:$0xff]  ;;  %v241_v2 = vld [vmem:[%s1008_s1 + $0x68] sm:$0xff]  ;;  %v718_v4 = vmov 0.0   ;;  %s1020_s11 = smov (!%p220_p10, %s557_s11), 3  ;;  %vm256_vm0 = vcmask 523264   ;;  %v246_v51 = vlaneseq }
  0x14   : > { %279 = vmatprep.subr.mxu0 %v243_v0  ;;  %v240_v3 = vld [vmem:[%s1008_s1 + $0x60] sm:$0xff]  ;;  %327 = vmatprep.mubr.f32.mxu0 %v718_v4  ;;  %v239_v5 = vld [vmem:[%s1008_s1 + $0x58] sm:$0xff]  ;;  %v238_v6 = vld [vmem:[%s1008_s1 + $0x50] sm:$0xff]  ;;  %s558_s7 = sshll.u32 %s1020_s11, 3  ;;  %s662_s10 = scalar_lea.vmem %s661_s9, 512 }
  0x15   : > { %280 = vmatpush1.msra.mxu0 %v242_v1  ;;  %v237_v7 = vld [vmem:[%s1008_s1 + $0x48] sm:$0xff]  ;;  %v236_v8 = vld [vmem:[%s1008_s1 + $0x40] sm:$0xff]  ;;  %v391_v9 = vld [vmem:[%s1010_s3 + $0xf8] sm:$0xff]  ;;  %s223_s23 = scalar_lea.vmem %s1007_s0, %s558_s7  ;;  %v247_v52 = vshrl.u32 %v246_v51, 7  ;;  %s967_s7 = scalar_lea.sflag [#allocation3], %s216_s14 }
  0x16   : > { %281 = vmatprep.subr.mxu0 %v241_v2  ;;  %v375_v10 = vld [vmem:[%s1010_s3 + $0x78] sm:$0xff]  ;;  %568 = vmatprep.subr.mxu1 %v391_v9  ;;  %v390_v12 = vld [vmem:[%s1010_s3 + $0xf0] sm:$0xff]  ;;  %v389_v15 = vld [vmem:[%s1010_s3 + $0xe8] sm:$0xff] }
  0x17   : > { %282 = vmatpush1.msra.mxu0 %v240_v3  ;;  %v235_v11 = vld [vmem:[%s1008_s1 + $0x38] sm:$0xff]  ;;  %v374_v13 = vld [vmem:[%s1010_s3 + $0x70] sm:$0xff]  ;;  %569 = vmatpush3.msra.mxu1 %v375_v10  ;;  %v233_v16 = vld [vmem:[%s1008_s1 + $0x28] sm:$0xff]  ;;  %v248_v53 = vsub.s32 0, %v247_v52  ;;  %v252_v55 = vsub.s32 1, %v247_v52 }
  0x18   : > { %283 = vmatprep.subr.mxu0 %v239_v5  ;;  %v234_v14 = vld [vmem:[%s1008_s1 + $0x30] sm:$0xff]  ;;  %570 = vmatprep.subr.mxu1 %v390_v12  ;;  %v373_v17 = vld [vmem:[%s1010_s3 + $0x68] sm:$0xff]  ;;  %v232_v18 = vld [vmem:[%s1008_s1 + $0x20] sm:$0xff] }
  0x19   : > { %284 = vmatpush1.msra.mxu0 %v238_v6  ;;  %571 = vmatpush3.msra.mxu1 %v374_v13  ;;  %v231_v19 = vld [vmem:[%s1008_s1 + $0x18] sm:$0xff]  ;;  %v230_v20 = vld [vmem:[%s1008_s1 + $0x10] sm:$0xff]  ;;  %v229_v21 = vld [vmem:[%s1008_s1 + $0x8] sm:$0xff] }
  0x1a   : > { %285 = vmatprep.subr.mxu0 %v237_v7  ;;  %572 = vmatprep.subr.mxu1 %v389_v15  ;;  %v228_v22 = vld [vmem:[%s1008_s1] sm:$0xff]  ;;  %v227_v24 = vld [vmem:[%s223_s23 + $0x8] sm:$0xff]  ;;  %v387_v27 = vld [vmem:[%s1010_s3 + $0xd8] sm:$0xff] }
  0x1b   : > { %286 = vmatpush1.msra.mxu0 %v236_v8  ;;  %573 = vmatpush3.msra.mxu1 %v373_v17  ;;  %v226_v23 = vld [vmem:[%s223_s23] sm:$0xff]  ;;  %v371_v28 = vld [vmem:[%s1010_s3 + $0x58] sm:$0xff]  ;;  %v386_v29 = vld [vmem:[%s1010_s3 + $0xd0] sm:$0xff]  ;;  %s490_s23 = sshll.u32 %s218_s17, 4  ;;  %s964_s23 = int_to_ptr.vmem [resolvable:$true] %s490_s23 }
  0x1c   : > { %287 = vmatprep.subr.mxu0 %v235_v11  ;;  %v388_v25 = vld [vmem:[%s1010_s3 + $0xe0] sm:$0xff]  ;;  %v370_v30 = vld [vmem:[%s1010_s3 + $0x50] sm:$0xff]  ;;  %v385_v31 = vld [vmem:[%s1010_s3 + $0xc8] sm:$0xff]  ;;  %s656_s22 = scalar_lea.vmem %s964_s23, 256  ;;  %p663_p0 = scmp.lt.s32.totalorder %s964_s23, %s661_s9 }
  0x1d   : > { %288 = vmatpush1.msra.mxu0 %v234_v14  ;;  %574 = vmatprep.subr.mxu1 %v388_v25  ;;  %v372_v26 = vld [vmem:[%s1010_s3 + $0x60] sm:$0xff]  ;;  %v369_v32 = vld [vmem:[%s1010_s3 + $0x48] sm:$0xff]  ;;  %v383_v35 = vld [vmem:[%s1010_s3 + $0xb8] sm:$0xff]  ;;  %p657_p11 = scmp.ne.s32.totalorder %s964_s23, %s656_s22  ;;  %p664_p1 = scmp.lt.s32.totalorder %s662_s10, %s656_s22 }
  0x1e   : > { %289 = vmatprep.subr.mxu0 %v233_v16  ;;  %575 = vmatpush3.msra.mxu1 %v372_v26  ;;  %v384_v33 = vld [vmem:[%s1010_s3 + $0xc0] sm:$0xff]  ;;  %v367_v36 = vld [vmem:[%s1010_s3 + $0x38] sm:$0xff]  ;;  %v382_v37 = vld [vmem:[%s1010_s3 + $0xb0] sm:$0xff] }
  0x1f   : > { %290 = vmatpush1.msra.mxu0 %v232_v18  ;;  %576 = vmatprep.subr.mxu1 %v387_v27  ;;  %v368_v34 = vld [vmem:[%s1010_s3 + $0x40] sm:$0xff]  ;;  %v366_v38 = vld [vmem:[%s1010_s3 + $0x30] sm:$0xff]  ;;  %v381_v39 = vld [vmem:[%s1010_s3 + $0xa8] sm:$0xff]  ;;  %p658_p12 = pnand %p657_p11, %p790_p5  ;;  %p665_p2 = por %p664_p1, %p663_p0 }
  0x20   : > { %291 = vmatprep.subr.mxu0 %v231_v19  ;;  %577 = vmatpush3.msra.mxu1 %v371_v28  ;;  %v365_v40 = vld [vmem:[%s1010_s3 + $0x28] sm:$0xff]  ;;  %v380_v41 = vld [vmem:[%s1010_s3 + $0xa0] sm:$0xff]  ;;  %v379_v43 = vld [vmem:[%s1010_s3 + $0x98] sm:$0xff] }
  0x21   : > { %292 = vmatpush1.msra.mxu0 %v230_v20  ;;  %578 = vmatprep.subr.mxu1 %v386_v29  ;;  %v364_v42 = vld [vmem:[%s1010_s3 + $0x20] sm:$0xff]  ;;  %v363_v44 = vld [vmem:[%s1010_s3 + $0x18] sm:$0xff]  ;;  %v378_v45 = vld [vmem:[%s1010_s3 + $0x90] sm:$0xff]  ;;  %p659_p13 = pneg %p658_p12 }
  0x22   : > { %293 = vmatprep.subr.mxu0 %v229_v21  ;;  %579 = vmatpush3.msra.mxu1 %v370_v30  ;;  %v362_v46 = vld [vmem:[%s1010_s3 + $0x10] sm:$0xff]  ;;  %v377_v47 = vld [vmem:[%s1010_s3 + $0x88] sm:$0xff]  ;;  %v376_v49 = vld [vmem:[%s1010_s3 + $0x80] sm:$0xff] }
  0x23   : > { %294 = vmatpush1.msra.mxu0 %v228_v22  ;;  %580 = vmatprep.subr.mxu1 %v385_v31  ;;  %v361_v48 = vld [vmem:[%s1010_s3 + $0x8] sm:$0xff]  ;;  %v360_v50 = vld [vmem:[%s1010_s3] sm:$0xff]  ;;  %p666_p3 = pnand %p665_p2, %p659_p13 }
  0x24   : > { %559 = vmatmul.mubr.msk.f32.vlgmr.msra.gmra.mxu0 %vm256_vm0, %v226_v23  ;;  %581 = vmatpush3.msra.mxu1 %v369_v32  ;;  %v244_v54 = vld [vmem:[%s1009_s2] sm:$0x3] }
  0x25   : > { %333 = vmatprep.mubr.f32.mxu0 %v718_v4  ;;  %582 = vmatprep.subr.mxu1 %v384_v33  ;;  %v249_v56 = vrot.slane %v244_v54, %v248_v53  ;;  %v253_v57 = vrot.slane %v244_v54, %v252_v55  ;;  %v561_v23 = vld [vmem:[%s1011_s4] ss:$0 sm:$0xff] }
  0x26   : > { %583 = vmatpush3.msra.mxu1 %v368_v34 }
  0x27   : > { %584 = vmatprep.subr.mxu1 %v383_v35 }
  0x28   : > { %560 = vmatmul.mubr.msk.f32.gmra.mxu0 %vm256_vm0, %v227_v24  ;;  %585 = vmatpush3.msra.mxu1 %v367_v36 }
  0x29   : > { %586 = vmatprep.subr.mxu1 %v382_v37 }
  0x2a   : > { %587 = vmatpush3.msra.mxu1 %v366_v38 }
  0x2b   : > { %588 = vmatprep.subr.mxu1 %v381_v39 }
  0x2c   : > { %589 = vmatpush3.msra.mxu1 %v365_v40 }
  0x2d   : > { %590 = vmatprep.subr.mxu1 %v380_v41 }
  0x2e   : > { %591 = vmatpush3.msra.mxu1 %v364_v42 }
  0x2f   : > { %592 = vmatprep.subr.mxu1 %v379_v43 }
  0x30   : > { %593 = vmatpush3.msra.mxu1 %v363_v44 }
  0x31   : > { %594 = vmatprep.subr.mxu1 %v378_v45 }
  0x32   : > { %595 = vmatpush3.msra.mxu1 %v362_v46 }
  0x33   : > { %596 = vmatprep.subr.mxu1 %v377_v47 }
  0x34   : > { %597 = vmatpush3.msra.mxu1 %v361_v48 }
  0x35   : > { %598 = vmatprep.subr.mxu1 %v376_v49 }
  0x36   : > { %599 = vmatpush3.msra.mxu1 %v360_v50 }
  0xe4   : > { %v329_v58 = vpop.f32.mrf.mxu0 }
  0xe5   : > { %v330_v59 = vadd.f32 %v329_v58, %v249_v56 }
  0xe6   : > { %v331_v60 = vpop.f32.mrf.mxu0 }
  0xe7   : > { %v344_v61 = vmul.f32 0.70710677, %v330_v59  ;;  %v332_v62 = vadd.f32 %v331_v60, %v253_v57  ;;  %v340_v12 = vmul.f32 0.5, %v330_v59 }
  0xe8   : > { %v335_v63 = vpop.f32.mrf.mxu0 }
  0xe9   : > { %648 = verf.f32 %v344_v61  ;;  %v345_v0 = vmul.f32 0.70710677, %v332_v62  ;;  %v336_v1 = vadd.f32 %v335_v63, %v249_v56  ;;  %v341_v9 = vmul.f32 0.5, %v332_v62 }
  0xea   : > { %v337_v2 = vpop.f32.mrf.mxu0 }
  0xeb   : > { %650 = verf.f32 %v345_v0  ;;  %v346_v3 = vmul.f32 0.70710677, %v336_v1  ;;  %v338_v4 = vadd.f32 %v337_v2, %v253_v57  ;;  %v342_v19 = vmul.f32 0.5, %v336_v1 }
  0xed   : > { %652 = verf.f32 %v346_v3  ;;  %v347_v5 = vmul.f32 0.70710677, %v338_v4  ;;  %v343_v17 = vmul.f32 0.5, %v338_v4 }
  0xef   : > { %654 = verf.f32 %v347_v5 }
  0xf6   : > { %v649_v6 = vpop.eup %648 }
  0xf7   : > { %v352_v8 = vadd.f32 1.0, %v649_v6 }
  0xf8   : > { %v651_v7 = vpop.eup %650 }
  0xf9   : > { %v353_v10 = vadd.f32 1.0, %v651_v7  ;;  %v356_v15 = vmul.f32 %v352_v8, %v340_v12 }
  0xfa   : > { %v653_v11 = vpop.eup %652 }
  0xfb   : > { %v357_v13 = vmul.f32 %v353_v10, %v341_v9  ;;  %v354_v16 = vadd.f32 1.0, %v653_v11 }
  0xfc   : > { %v655_v14 = vpop.eup %654 }
  0xfd   : > { %463 = vmatprep.mubr.f32.mxu1 %v357_v13  ;;  %v355_v18 = vadd.f32 1.0, %v655_v14  ;;  %v358_v21 = vmul.f32 %v354_v16, %v342_v19 }
  0xfe   : > { %464 = vmatmul.mubr.f32.vlgmr.msra.gmra.mxu1 %v356_v15 }
  0xff   : > { %v359_v20 = vmul.f32 %v355_v18, %v343_v17 }
 0x101   : > { %468 = vmatprep.mubr.f32.mxu1 %v359_v20 }
 0x102   : > { %469 = vmatmul.mubr.f32.gmra.mxu1 %v358_v21 }
 0x1be   : > { %v600_v22 = vpop.f32.mrf.mxu1 }
 0x1c0   : > { %v601_v24 = vpop.f32.mrf.mxu1 }
 0x1c1   : > { %v602_v25 = vadd.f32 %v601_v24, %v600_v22 }
 0x1c2   : > { %v603_v26 = vpop.f32.mrf.mxu1 }
 0x1c3   : > { %v466_v27 = vadd.f32 %v602_v25, %v561_v23 }
 0x1c4   : > { %v604_v28 = vpop.f32.mrf.mxu1 }
 0x1c5   : > { %474 = vst.msk [vmem:[%s218_s17] sm:$0xff] %vm256_vm0, %v466_v27  ;;  %v605_v29 = vadd.f32 %v604_v28, %v603_v26 }
 0x1c7   : > { %v471_v30 = vadd.f32 %v605_v29, %v561_v23 }
 0x1c9   : > { %475 = vst.msk [vmem:[%s218_s17 + $0x8] sm:$0xff] %vm256_vm0, %v471_v30 }
 0x1ca   : > { %669 = shalt.err (!%p666_p3)
}
 0x1cb   : > { %s670_s12 = scalar_lea.hbm %s962_s6, 256  ;;  %s674_s15 = scalar_lea.hbm %s1012_s5, 512 }
 0x1cc   : > { %p671_p4 = scmp.ne.s32.totalorder %s962_s6, %s670_s12  ;;  %p675_p9 = scmp.lt.s32.totalorder %s962_s6, %s1012_s5 }
 0x1cd   : > { %p676_p10 = scmp.lt.s32.totalorder %s674_s15, %s670_s12 }
 0x1ce   : > { %p672_p7 = pnand %p671_p4, %p790_p5 }
 0x1cf   : > { %p677_p11 = por %p676_p10, %p675_p9 }
 0x1d0   : > { %p673_p8 = pneg %p672_p7 }
 0x1d2   : > { %p678_p12 = pnand %p677_p11, %p673_p8 }
 0x1d4   : > { %681 = shalt.err (!%p678_p12)
}
 0x1d5   : > { %s720_s17 = smov 128   ;;  %s721_s25 = smov 8  }
 0x1d6   : > { %606 = dma.vmem_to_hbm [thread:$0]  (%p790_p5), %s964_s23, 256, %s962_s6, %s967_s7, %s720_s17, %s720_s17, %s721_s25  }
 0x1d7 PF: > { %p612_p13 = scmp.ge.s32.totalorder %s716_s21, 2  ;;  %s505_s26 = sand.u32 1, %s704_s18  }
 0x1d8   : > { %s506_s30 = scalar_lea.sflag [#allocation3], %s505_s26 }
 0x1d9   : > { %p609_p0 = pnand %p612_p13, %p794_p6 }
 0x1db   : > { %p610_p1 = pneg %p609_p0 }
 0x1dd   : > { %699 = dma.done.wait (%p610_p1), %s506_s30, 256  }
 0x1de   : > { %701 = vsyncadd (%p610_p1), %s506_s30, 4294967040  ;;  %p15_p2 = scmp.ge.s32.totalorder %s777_s24, 4   ;;  %s1015_s18 = smov %s708_s19 }
 0x1df   : > { %s1016_s19 = smov %s712_s20  ;;  %s1017_s20 = smov %s788_s27 }
 0x1e0   : > { %s1018_s21 = smov %s777_s24  ;;  %17 = sbr.rel (!%p15_p2) target bundleno = 3 (0x3), region = 75 }
 0x1e5   :  { %511 = vsyncpa [#allocation3], 1 }
 0x1e6   :  { %513 = vsyncpa [#allocation3 + $0x1], 1 }

</bundles_post_ra>
